<compile_context>
chip_gen: v6e
topology: v6e:2x2x1
jax: 0.10.0
libtpu: 0.0.40
codegen_flags: <defaults>
</compile_context>

<pallas_src>
import jax
import jax.numpy as jnp
from jax.experimental import pallas as pl
from jax.experimental.pallas import tpu as pltpu

NB_ACTIONS = 3
IN_DIM = 5
HIDDEN = 128
K_PAD = 8          # layer-1 contraction padded to a full sublane group
OUT_ROWS = 8       # Q rows padded to a full sublane group (rows 3..7 == 0)
LANES = 128        # batch sits on the lane axis -> tiles are multiples of 128
MAX_TILE_B = 4096  # batch columns per grid step (VMEM footprint ~5 MiB, safe on all gens)


def _round_up(n, m):
    return ((n + m - 1) // m) * m


def dqn_kernel(xT_ref, w1_ref, b1_ref, w2_ref, b2_ref, w3_ref, b3_ref, out_ref):
    """Fused 3-layer MLP in feature-major layout.

    xT_ref : (8, TILE_B)   f32  x^T, rows 5..7 zero-padded
    w1_ref : (128, 8)      f32  fc1.weight, zero-padded on the input dim
    b1_ref : (128, 1)      f32
    w2_ref : (128, 128)    bf16 fc2.weight
    b2_ref : (128, 1)      f32
    w3_ref : (8, 128)      bf16 fc3.weight, zero-padded to 8 output rows
    b3_ref : (8, 1)        f32  zero-padded
    out_ref: (8, TILE_B)   f32  q^T, rows 3..7 are exact zeros
    """
    x = xT_ref[...]

    # Layer 1 on the MXU (K=8 is a single pass; the MXU has huge slack here).
    h1 = jnp.dot(w1_ref[...], x, preferred_element_type=jnp.float32)
    h1 = jnp.maximum(h1 + b1_ref[...], 0.0)                   # (128, TILE_B) f32

    # Layer 2: bf16 MXU operands, f32 accumulation, f32 bias/ReLU epilogue.
    h2 = jnp.dot(w2_ref[...], h1.astype(jnp.bfloat16),
                 preferred_element_type=jnp.float32)
    h2 = jnp.maximum(h2 + b2_ref[...], 0.0)                   # (128, TILE_B) f32

    # Layer 3: (8, 128) @ (128, TILE_B) -> (8, TILE_B); rows 3..7 stay zero.
    q = jnp.dot(w3_ref[...], h2.astype(jnp.bfloat16),
                preferred_element_type=jnp.float32)
    out_ref[...] = (q + b3_ref[...]).astype(out_ref.dtype)


def prepare_params(params):
    """One-time kernel-side weight prep (hoisted out of the per-step RL loop).

    Accepts PyTorch-layout params: w* = (out_features, in_features), b* = (out,).
    """
    w1 = params["w1"].astype(jnp.float32).reshape(HIDDEN, IN_DIM)
    b1 = params["b1"].astype(jnp.float32).reshape(HIDDEN, 1)
    w2 = params["w2"].astype(jnp.bfloat16).reshape(HIDDEN, HIDDEN)
    b2 = params["b2"].astype(jnp.float32).reshape(HIDDEN, 1)
    w3 = params["w3"].astype(jnp.bfloat16).reshape(NB_ACTIONS, HIDDEN)
    b3 = params["b3"].astype(jnp.float32).reshape(NB_ACTIONS, 1)

    w1p = jnp.zeros((HIDDEN, K_PAD), jnp.float32).at[:, :IN_DIM].set(w1)
    w3p = jnp.zeros((OUT_ROWS, HIDDEN), jnp.bfloat16).at[:NB_ACTIONS, :].set(w3)
    b3p = jnp.zeros((OUT_ROWS, 1), jnp.float32).at[:NB_ACTIONS, :].set(b3)
    return dict(w1p=w1p, b1=b1, w2=w2, b2=b2, w3p=w3p, b3p=b3p)


def _choose_tiles(batch):
    n_tiles = max(1, pl.cdiv(batch, MAX_TILE_B))
    if n_tiles == 1 and batch > LANES:
        n_tiles = 2          # give ("parallel",) two grid steps -> both v7x TCs
    tile_b = _round_up(pl.cdiv(batch, n_tiles), LANES)
    b_pad = _round_up(batch, tile_b)
    return tile_b, b_pad


def dqn_forward(x, prepared):
    """Fused DQN forward pass: fc3(relu(fc2(relu(fc1(x))))).

    x: (B, 5) float32 state batch; prepared: output of prepare_params().
    returns: (B, 3) float32 Q-values.
    """
    if "w1p" not in prepared:          # robustness: accept raw PyTorch-layout params
        prepared = prepare_params(prepared)

    B = x.shape[0]
    tile_b, b_pad = _choose_tiles(B)
    grid = (b_pad // tile_b,)

    # Feature-major input: (8, b_pad); rows 5..7 and columns B.. are zeros.
    xT = jnp.zeros((K_PAD, b_pad), jnp.float32).at[:IN_DIM, :B].set(
        x.astype(jnp.float32).T)

    const = lambda i: (0, 0)           # weights/biases stay resident in VMEM
    qT = pl.pallas_call(
        dqn_kernel,
        out_shape=jax.ShapeDtypeStruct((OUT_ROWS, b_pad), jnp.float32),
        grid=grid,
        in_specs=[
            pl.BlockSpec((K_PAD, tile_b), lambda i: (0, i)),     # x^T tile
            pl.BlockSpec((HIDDEN, K_PAD), const),                # w1 (padded K)
            pl.BlockSpec((HIDDEN, 1), const),                    # b1
            pl.BlockSpec((HIDDEN, HIDDEN), const),               # w2 (bf16)
            pl.BlockSpec((HIDDEN, 1), const),                    # b2
            pl.BlockSpec((OUT_ROWS, HIDDEN), const),             # w3 (bf16, padded)
            pl.BlockSpec((OUT_ROWS, 1), const),                  # b3 (padded)
        ],
        out_specs=pl.BlockSpec((OUT_ROWS, tile_b), lambda i: (0, i)),
        compiler_params=pltpu.CompilerParams(
            dimension_semantics=("parallel",),                   # 2-TC sharding on v7x
        ),
    )(xT, prepared["w1p"], prepared["b1"], prepared["w2"],
      prepared["b2"], prepared["w3p"], prepared["b3p"])

    return qT[:NB_ACTIONS, :B].T       # tiny 8-row strip -> cheap slice/transpose


def init_params(key):
    """PyTorch-Linear-style init: uniform(+/- 1/sqrt(fan_in)), (out, in) layout."""
    def linear(key, fan_in, fan_out):
        kw, kb = jax.random.split(key)
        bound = 1.0 / jnp.sqrt(jnp.float32(fan_in))
        w = jax.random.uniform(kw, (fan_out, fan_in), jnp.float32, -bound, bound)
        b = jax.random.uniform(kb, (fan_out,), jnp.float32, -bound, bound)
        return w, b

    k1, k2, k3 = jax.random.split(key, 3)
    w1, b1 = linear(k1, IN_DIM, HIDDEN)
    w2, b2 = linear(k2, HIDDEN, HIDDEN)
    w3, b3 = linear(k3, HIDDEN, NB_ACTIONS)
    return dict(w1=w1, b1=b1, w2=w2, b2=b2, w3=w3, b3=b3)


def dqn_forward_ref(x, p):
    """Pure-JAX reference (bf16 MXU operands for layers 2/3, like the kernel)."""
    h1 = jnp.maximum(
        jnp.dot(x, p["w1"].T, precision=jax.lax.Precision.HIGHEST) + p["b1"], 0.0)
    h2 = jnp.dot(h1.astype(jnp.bfloat16), p["w2"].T.astype(jnp.bfloat16),
                 preferred_element_type=jnp.float32)
    h2 = jnp.maximum(h2 + p["b2"], 0.0)
    q = jnp.dot(h2.astype(jnp.bfloat16), p["w3"].T.astype(jnp.bfloat16),
                preferred_element_type=jnp.float32)
    return q + p["b3"]


if __name__ == "__main__":
    key = jax.random.PRNGKey(0)
    kp, kx1, kx2 = jax.random.split(key, 3)

    params = init_params(kp)
    prepared = prepare_params(params)   # hoisted out of the "RL loop"

    # State vector: [ball_x, ball_y, ball_vx, ball_vy, paddle_y]
    batch = 2
    x = jax.random.uniform(kx1, (batch, IN_DIM), jnp.float32, -1.0, 1.0)
    q = jax.block_until_ready(dqn_forward(x, prepared))
    q_ref = dqn_forward_ref(x, params)
    assert q.shape == (batch, NB_ACTIONS)
    assert jnp.allclose(q, q_ref, atol=2e-2, rtol=2e-2), (q, q_ref)

    # Multi-tile path (grid of 2 steps) sanity check.
    x2 = jax.random.uniform(kx2, (200, IN_DIM), jnp.float32, -1.0, 1.0)
    q2 = jax.block_until_ready(dqn_forward(x2, prepared))
    q2_ref = dqn_forward_ref(x2, params)
    assert q2.shape == (200, NB_ACTIONS)
    assert jnp.allclose(q2, q2_ref, atol=2e-2, rtol=2e-2)

    print("KERNEL_OK")
</pallas_src>

<mosaic_0001>
module attributes {stable_mosaic.version = 11 : i64} {
  func.func @dqn_kernel(%arg0: i32, %arg1: memref<8x128xf32, #tpu.memory_space<vmem>>, %arg2: memref<128x8xf32, #tpu.memory_space<vmem>>, %arg3: memref<128x1xf32, #tpu.memory_space<vmem>>, %arg4: memref<128x128xbf16, #tpu.memory_space<vmem>>, %arg5: memref<128x1xf32, #tpu.memory_space<vmem>>, %arg6: memref<8x128xbf16, #tpu.memory_space<vmem>>, %arg7: memref<8x1xf32, #tpu.memory_space<vmem>>, %arg8: memref<8x128xf32, #tpu.memory_space<vmem>>) attributes {dimension_semantics = [#tpu.dimension_semantics<parallel>], iteration_bounds = array<i64: 1>, scalar_prefetch = 0 : i64, scratch_operands = 0 : i64, tpu.core_type = #tpu.core_type<tc>, window_params = [{transform_indices = @transform_0, window_bounds = array<i64: 8, 128>}, {pipeline_mode = #tpu.pipeline_mode<synchronous>, transform_indices = @transform_1, window_bounds = array<i64: 128, 8>}, {pipeline_mode = #tpu.pipeline_mode<synchronous>, transform_indices = @transform_2, window_bounds = array<i64: 128, 1>}, {pipeline_mode = #tpu.pipeline_mode<synchronous>, transform_indices = @transform_3, window_bounds = array<i64: 128, 128>}, {pipeline_mode = #tpu.pipeline_mode<synchronous>, transform_indices = @transform_4, window_bounds = array<i64: 128, 1>}, {pipeline_mode = #tpu.pipeline_mode<synchronous>, transform_indices = @transform_5, window_bounds = array<i64: 8, 128>}, {pipeline_mode = #tpu.pipeline_mode<synchronous>, transform_indices = @transform_6, window_bounds = array<i64: 8, 1>}, {transform_indices = @transform_7, window_bounds = array<i64: 8, 128>}]} {
    %c0 = arith.constant 0 : index
    %c0_0 = arith.constant 0 : index
    %0 = vector.load %arg1[%c0, %c0_0] : memref<8x128xf32, #tpu.memory_space<vmem>>, vector<8x128xf32>
    %c0_1 = arith.constant 0 : index
    %c0_2 = arith.constant 0 : index
    %1 = vector.load %arg2[%c0_1, %c0_2] : memref<128x8xf32, #tpu.memory_space<vmem>>, vector<128x8xf32>
    %cst = arith.constant dense<0.000000e+00> : vector<128x128xf32>
    %2 = tpu.matmul %1, %0, %cst {dimension_numbers = #tpu.dot_dimension_numbers<[1], [0], [0], [1], [0, 0, 1, 1], [], []>} : vector<128x8xf32>, vector<8x128xf32>, vector<128x128xf32> -> vector<128x128xf32>
    %c0_3 = arith.constant 0 : index
    %c0_4 = arith.constant 0 : index
    %3 = vector.load %arg3[%c0_3, %c0_4] : memref<128x1xf32, #tpu.memory_space<vmem>>, vector<128x1xf32>
    %4 = vector.broadcast %3 : vector<128x1xf32> to vector<128x128xf32>
    %5 = arith.addf %2, %4 : vector<128x128xf32>
    %cst_5 = arith.constant 0.000000e+00 : f32
    %6 = vector.broadcast %cst_5 : f32 to vector<128x128xf32>
    %7 = arith.maximumf %5, %6 : vector<128x128xf32>
    %c0_6 = arith.constant 0 : index
    %c0_7 = arith.constant 0 : index
    %8 = vector.load %arg4[%c0_6, %c0_7] : memref<128x128xbf16, #tpu.memory_space<vmem>>, vector<128x128xbf16>
    %9 = arith.truncf %7 : vector<128x128xf32> to vector<128x128xbf16>
    %cst_8 = arith.constant dense<0.000000e+00> : vector<128x128xf32>
    %10 = tpu.matmul %8, %9, %cst_8 {dimension_numbers = #tpu.dot_dimension_numbers<[1], [0], [0], [1], [0, 0, 1, 1], [], []>} : vector<128x128xbf16>, vector<128x128xbf16>, vector<128x128xf32> -> vector<128x128xf32>
    %c0_9 = arith.constant 0 : index
    %c0_10 = arith.constant 0 : index
    %11 = vector.load %arg5[%c0_9, %c0_10] : memref<128x1xf32, #tpu.memory_space<vmem>>, vector<128x1xf32>
    %12 = vector.broadcast %11 : vector<128x1xf32> to vector<128x128xf32>
    %13 = arith.addf %10, %12 : vector<128x128xf32>
    %cst_11 = arith.constant 0.000000e+00 : f32
    %14 = vector.broadcast %cst_11 : f32 to vector<128x128xf32>
    %15 = arith.maximumf %13, %14 : vector<128x128xf32>
    %c0_12 = arith.constant 0 : index
    %c0_13 = arith.constant 0 : index
    %16 = vector.load %arg6[%c0_12, %c0_13] : memref<8x128xbf16, #tpu.memory_space<vmem>>, vector<8x128xbf16>
    %17 = arith.truncf %15 : vector<128x128xf32> to vector<128x128xbf16>
    %cst_14 = arith.constant dense<0.000000e+00> : vector<8x128xf32>
    %18 = tpu.matmul %16, %17, %cst_14 {dimension_numbers = #tpu.dot_dimension_numbers<[1], [0], [0], [1], [0, 0, 1, 1], [], []>} : vector<8x128xbf16>, vector<128x128xbf16>, vector<8x128xf32> -> vector<8x128xf32>
    %c0_15 = arith.constant 0 : index
    %c0_16 = arith.constant 0 : index
    %19 = vector.load %arg7[%c0_15, %c0_16] : memref<8x1xf32, #tpu.memory_space<vmem>>, vector<8x1xf32>
    %20 = vector.broadcast %19 : vector<8x1xf32> to vector<8x128xf32>
    %21 = arith.addf %18, %20 : vector<8x128xf32>
    %c0_17 = arith.constant 0 : index
    %c0_18 = arith.constant 0 : index
    %22 = vector.load %arg8[%c0_17, %c0_18] : memref<8x128xf32, #tpu.memory_space<vmem>>, vector<8x128xf32>
    tpu.vector_store %arg8[%c0_17, %c0_18], %21 {strides = array<i32>} : memref<8x128xf32, #tpu.memory_space<vmem>>, vector<8x128xf32>,
    return
  }
  func.func @transform_0(%arg0: i32) -> (i32, i32) {
    %c0_i32 = arith.constant 0 : i32
    %c0_i32_0 = arith.constant 0 : i32
    return %c0_i32, %arg0 : i32, i32
  }
  func.func @transform_1(%arg0: i32) -> (i32, i32) {
    %c0_i32 = arith.constant 0 : i32
    %c0_i32_0 = arith.constant 0 : i32
    %c0_i32_1 = arith.constant 0 : i32
    return %c0_i32, %c0_i32_0 : i32, i32
  }
  func.func @transform_2(%arg0: i32) -> (i32, i32) {
    %c0_i32 = arith.constant 0 : i32
    %c0_i32_0 = arith.constant 0 : i32
    %c0_i32_1 = arith.constant 0 : i32
    return %c0_i32, %c0_i32_0 : i32, i32
  }
  func.func @transform_3(%arg0: i32) -> (i32, i32) {
    %c0_i32 = arith.constant 0 : i32
    %c0_i32_0 = arith.constant 0 : i32
    %c0_i32_1 = arith.constant 0 : i32
    return %c0_i32, %c0_i32_0 : i32, i32
  }
  func.func @transform_4(%arg0: i32) -> (i32, i32) {
    %c0_i32 = arith.constant 0 : i32
    %c0_i32_0 = arith.constant 0 : i32
    %c0_i32_1 = arith.constant 0 : i32
    return %c0_i32, %c0_i32_0 : i32, i32
  }
  func.func @transform_5(%arg0: i32) -> (i32, i32) {
    %c0_i32 = arith.constant 0 : i32
    %c0_i32_0 = arith.constant 0 : i32
    %c0_i32_1 = arith.constant 0 : i32
    return %c0_i32, %c0_i32_0 : i32, i32
  }
  func.func @transform_6(%arg0: i32) -> (i32, i32) {
    %c0_i32 = arith.constant 0 : i32
    %c0_i32_0 = arith.constant 0 : i32
    %c0_i32_1 = arith.constant 0 : i32
    return %c0_i32, %c0_i32_0 : i32, i32
  }
  func.func @transform_7(%arg0: i32) -> (i32, i32) {
    %c0_i32 = arith.constant 0 : i32
    %c0_i32_0 = arith.constant 0 : i32
    return %c0_i32, %arg0 : i32, i32
  }
}

</mosaic_0001>

<bundles_post_ra>
// kernel: tpu_custom_call.1
= control target key start
LH: loop header
LB: loop body
LE: loop exit
PB: predicated region body
PF: predicated region fallthrough
CT: control target
= control target key end

     0   :  { %vm141_vm0 = vcmask 64512   ;;  %v882_v4 = vmov 0   ;;  %s1149_s0 = inlined_call_operand.vmem [shape: f32[8,128], index: 0, kind: input, shape index: {}]   ;;  %s1150_s1 = inlined_call_operand.vmem [shape: f32[128,8], index: 1, kind: input, shape index: {}]   ;;  %s1151_s2 = inlined_call_operand.vmem [shape: f32[128,1], index: 2, kind: input, shape index: {}]   ;;  %s1152_s3 = inlined_call_operand.vmem [shape: bf16[128,128], index: 3, kind: input, shape index: {}]   ;;  %s1153_s4 = inlined_call_operand.vmem [shape: f32[128,1], index: 4, kind: input, shape index: {}]   ;;  %s1154_s5 = inlined_call_operand.vmem [shape: bf16[8,128], index: 5, kind: input, shape index: {}]   ;;  %s1155_s6 = inlined_call_operand.vmem [shape: f32[8,1], index: 6, kind: input, shape index: {}]   ;;  %s1156_s7 = inlined_call_operand.hbm [shape: f32[8,128], index: 7, kind: output, shape index: {}]  }
   0x1   :  { %v28_v0 = vld [vmem:[%s1149_s0] sm:$0xff]  ;;  %v30_v2 = vld [vmem:[%s1150_s1 + $0x8] sm:$0xff]  ;;  %v31_v3 = vld [vmem:[%s1150_s1 + $0x10] sm:$0xff]  ;;  %850 = vset.pattern.permute.xlu0 %v882_v4  ;;  %851 = vset.pattern.permute.xlu1 %v882_v4 }
   0x2   :  { %v29_v1 = vld [vmem:[%s1150_s1] sm:$0xff]  ;;  %768 = vmatprep.subr.mxu0 %v28_v0  ;;  %v32_v5 = vld [vmem:[%s1150_s1 + $0x18] sm:$0xff]  ;;  %v59_v7 = vld [vmem:[%s1151_s2 + $0x70] sm:$0xff] }
   0x3   :  { %770 = vmatprep.mubr.msk.f32.mxu0 %vm141_vm0, %v29_v1  ;;  %769 = vmatpush3.msra.mxu0 %v28_v0  ;;  %v33_v6 = vld [vmem:[%s1150_s1 + $0x20] sm:$0xff]  ;;  %v60_v9 = vld [vmem:[%s1151_s2 + $0x78] sm:$0xff]  ;;  %v34_v10 = vld [vmem:[%s1150_s1 + $0x28] sm:$0xff] }
   0x4   :  { %771 = vmatmul.mubr.msk.f32.vlgmr.msra.gmra.mxu0 %vm141_vm0, %v30_v2  ;;  %133 = vperm.xlu0 %850, %v59_v7   ;;  %v57_v8 = vld [vmem:[%s1151_s2 + $0x60] sm:$0xff]  ;;  %v58_v11 = vld [vmem:[%s1151_s2 + $0x68] sm:$0xff]  ;;  %v35_v12 = vld [vmem:[%s1150_s1 + $0x30] sm:$0xff] }
   0x5   :  { %773 = vmatprep.mubr.msk.f32.mxu0 %vm141_vm0, %v31_v3  ;;  %123 = vperm.xlu1 %851, %v57_v8   ;;  %v55_v13 = vld [vmem:[%s1151_s2 + $0x50] sm:$0xff]  ;;  %v36_v14 = vld [vmem:[%s1150_s1 + $0x38] sm:$0xff]  ;;  %v37_v16 = vld [vmem:[%s1150_s1 + $0x40] sm:$0xff] }
   0x6   :  { %v56_v15 = vld [vmem:[%s1151_s2 + $0x58] sm:$0xff]  ;;  %v38_v17 = vld [vmem:[%s1150_s1 + $0x48] sm:$0xff]  ;;  %v53_v18 = vld [vmem:[%s1151_s2 + $0x40] sm:$0xff] }
   0x7   :  { %v39_v19 = vld [vmem:[%s1150_s1 + $0x50] sm:$0xff]  ;;  %v54_v20 = vld [vmem:[%s1151_s2 + $0x48] sm:$0xff]  ;;  %v40_v22 = vld [vmem:[%s1150_s1 + $0x58] sm:$0xff] }
   0x8   :  { %774 = vmatmul.mubr.msk.f32.gmra.mxu0 %vm141_vm0, %v32_v5  ;;  %138 = vperm.xlu0 %850, %v60_v9   ;;  %v51_v21 = vld [vmem:[%s1151_s2 + $0x30] sm:$0xff]  ;;  %v52_v23 = vld [vmem:[%s1151_s2 + $0x38] sm:$0xff]  ;;  %v41_v24 = vld [vmem:[%s1150_s1 + $0x60] sm:$0xff] }
   0x9   :  { %776 = vmatprep.mubr.msk.f32.mxu0 %vm141_vm0, %v33_v6  ;;  %128 = vperm.xlu1 %851, %v58_v11  }
   0xc   :  { %777 = vmatmul.mubr.msk.f32.gmra.mxu0 %vm141_vm0, %v34_v10  ;;  %113 = vperm.xlu0 %850, %v55_v13  }
   0xd   :  { %779 = vmatprep.mubr.msk.f32.mxu0 %vm141_vm0, %v35_v12  ;;  %118 = vperm.xlu1 %851, %v56_v15  }
  0x10   :  { %780 = vmatmul.mubr.msk.f32.gmra.mxu0 %vm141_vm0, %v36_v14  ;;  %103 = vperm.xlu0 %850, %v53_v18  }
  0x11   :  { %782 = vmatprep.mubr.msk.f32.mxu0 %vm141_vm0, %v37_v16  ;;  %108 = vperm.xlu1 %851, %v54_v20  }
  0x14   :  { %783 = vmatmul.mubr.msk.f32.gmra.mxu0 %vm141_vm0, %v38_v17  ;;  %93 = vperm.xlu0 %850, %v51_v21  }
  0x15   :  { %785 = vmatprep.mubr.msk.f32.mxu0 %vm141_vm0, %v39_v19 }
  0x16   :  { %12 = vsyncpa [#allocation3], 0  ;;  %v49_v25 = vld [vmem:[%s1151_s2 + $0x20] sm:$0xff]  ;;  %98 = vperm.xlu1 %851, %v52_v23   ;;  %v42_v26 = vld [vmem:[%s1150_s1 + $0x68] sm:$0xff]  ;;  %vm884_vm1 = vmmov 0   ;;  %s885_s15 = smov [#allocation2]  }
  0x17   :  { %v50_v27 = vld [vmem:[%s1151_s2 + $0x28] sm:$0xff]  ;;  %v43_v28 = vld [vmem:[%s1150_s1 + $0x70] sm:$0xff]  ;;  %v44_v30 = vld [vmem:[%s1150_s1 + $0x78] sm:$0xff]  ;;  %s694_s16 = sshll.u32 %s885_s15, 4  ;;  %s695_s16 = int_to_ptr.vmem [resolvable:$true] %s694_s16 }
  0x18   :  { %786 = vmatmul.mubr.msk.f32.gmra.mxu0 %vm141_vm0, %v40_v22  ;;  %83 = vperm.xlu0 %850, %v49_v25   ;;  %v47_v29 = vld [vmem:[%s1151_s2 + $0x10] sm:$0xff]  ;;  %v48_v31 = vld [vmem:[%s1151_s2 + $0x18] sm:$0xff]  ;;  %v45_v32 = vld [vmem:[%s1151_s2] sm:$0xff]  ;;  %s860_s17 = scalar_lea.vmem %s695_s16, 128  ;;  %p865_p1 = scmp.lt.s32.totalorder %s695_s16, %s695_s16 }
  0x19   :  { %788 = vmatprep.mubr.msk.f32.mxu0 %vm141_vm0, %v41_v24  ;;  %v46_v33 = vld [vmem:[%s1151_s2 + $0x8] sm:$0xff]  ;;  %v389_v34 = vld [vmem:[%s1153_s4 + $0x70] sm:$0xff]  ;;  %v390_v35 = vld [vmem:[%s1153_s4 + $0x78] sm:$0xff]  ;;  %p861_p0 = scmp.ne.s32.totalorder %s695_s16, %s860_s17  ;;  %p866_p2 = scmp.lt.s32.totalorder %s860_s17, %s860_s17 }
  0x1a   :  { %88 = vperm.xlu1 %851, %v50_v27   ;;  %v387_v36 = vld [vmem:[%s1153_s4 + $0x60] sm:$0xff]  ;;  %v388_v37 = vld [vmem:[%s1153_s4 + $0x68] sm:$0xff]  ;;  %v385_v38 = vld [vmem:[%s1153_s4 + $0x50] sm:$0xff] }
  0x1b   :  { %v386_v39 = vld [vmem:[%s1153_s4 + $0x58] sm:$0xff]  ;;  %v383_v40 = vld [vmem:[%s1153_s4 + $0x40] sm:$0xff]  ;;  %v384_v41 = vld [vmem:[%s1153_s4 + $0x48] sm:$0xff]  ;;  %p867_p3 = por %p866_p2, %p865_p1 }
  0x1c   :  { %789 = vmatmul.mubr.msk.f32.gmra.mxu0 %vm141_vm0, %v42_v26  ;;  %73 = vperm.xlu0 %850, %v47_v29   ;;  %v381_v42 = vld [vmem:[%s1153_s4 + $0x30] sm:$0xff]  ;;  %v382_v43 = vld [vmem:[%s1153_s4 + $0x38] sm:$0xff]  ;;  %v379_v44 = vld [vmem:[%s1153_s4 + $0x20] sm:$0xff] }
  0x1d   :  { %791 = vmatprep.mubr.msk.f32.mxu0 %vm141_vm0, %v43_v28  ;;  %v380_v45 = vld [vmem:[%s1153_s4 + $0x28] sm:$0xff]  ;;  %v377_v46 = vld [vmem:[%s1153_s4 + $0x10] sm:$0xff]  ;;  %v378_v47 = vld [vmem:[%s1153_s4 + $0x18] sm:$0xff]  ;;  %p868_p4 = pnand %p867_p3, %p861_p0 }
  0x1e   :  { %78 = vperm.xlu1 %851, %v48_v31   ;;  %v375_v48 = vld [vmem:[%s1153_s4] sm:$0xff]  ;;  %v376_v49 = vld [vmem:[%s1153_s4 + $0x8] sm:$0xff] }
  0x1f   :  { %v641_v50 = vld [vmem:[%s1155_s6] sm:$0xff] }
  0x20   :  { %792 = vmatmul.mubr.msk.f32.gmra.mxu0 %vm141_vm0, %v44_v30  ;;  %63 = vperm.xlu0 %850, %v45_v32   ;;  %v852_v51 = vld [vmem:[%s1152_s3] sm:$0xff]  }
  0x21   :  { %810 = vmatprep.mubr.bf16.mxu1 %v852_v51 }
  0x22   :  { %68 = vperm.xlu1 %851, %v46_v33  }
  0x24   :  { %463 = vperm.xlu0 %850, %v389_v34  }
  0x26   :  { %468 = vperm.xlu1 %851, %v390_v35  }
  0x28   :  { %453 = vperm.xlu0 %850, %v387_v36  }
  0x2a   :  { %458 = vperm.xlu1 %851, %v388_v37  }
  0x2c   :  { %443 = vperm.xlu0 %850, %v385_v38  }
  0x2e   :  { %448 = vperm.xlu1 %851, %v386_v39  }
  0x30   :  { %433 = vperm.xlu0 %850, %v383_v40  }
  0x32   :  { %438 = vperm.xlu1 %851, %v384_v41  }
  0x34   :  { %423 = vperm.xlu0 %850, %v381_v42  }
  0x36   :  { %428 = vperm.xlu1 %851, %v382_v43  }
  0x38   :  { %413 = vperm.xlu0 %850, %v379_v44  }
  0x3a   :  { %418 = vperm.xlu1 %851, %v380_v45  }
  0x3c   :  { %403 = vperm.xlu0 %850, %v377_v46  }
  0x3e   :  { %408 = vperm.xlu1 %851, %v378_v47  }
  0x40   :  { %393 = vperm.xlu0 %850, %v375_v48  }
  0x42   :  { %398 = vperm.xlu1 %851, %v376_v49  }
  0x44   :  { %644 = vperm.xlu0 %850, %v641_v50  }
  0x7f   :  { %v134_v57 = vpop.permute.xlu0 %133 }
  0x80   :  { %v124_v59 = vpop.permute.xlu1 %123 }
  0x83   :  { %v139_v62 = vpop.permute.xlu0 %138 }
  0x84   :  { %v129_v0 = vpop.permute.xlu1 %128 }
  0x87   :  { %v114_v3 = vpop.permute.xlu0 %113 }
  0x88   :  { %v119_v5 = vpop.permute.xlu1 %118 }
  0x8b   :  { %v104_v8 = vpop.permute.xlu0 %103 }
  0x8c   :  { %v109_v12 = vpop.permute.xlu1 %108 }
  0x8f   :  { %v94_v20 = vpop.permute.xlu0 %93 }
  0x91   :  { %v99_v24 = vpop.permute.xlu1 %98 }
  0x93   :  { %v84_v30 = vpop.permute.xlu0 %83 }
  0x95   :  { %v89_v34 = vpop.permute.xlu1 %88 }
  0x97   :  { %v74_v40 = vpop.permute.xlu0 %73 }
  0x99   :  { %v79_v43 = vpop.permute.xlu1 %78 }
  0x9b   :  { %v64_v49 = vpop.permute.xlu0 %63 }
  0xc4   :  { %v1095_v52 = vpop.f32.mrf.mxu0 }
  0xc6   :  { %v1097_v53 = vpop.f32.mrf.mxu0 }
  0xc7   :  { %v257_v50 = vadd.f32 %v1097_v53, %v64_v49  ;;  %v853_v53 = vld [vmem:[%s1152_s3 + $0x8] sm:$0xff]  }
  0xc8   :  { %v1099_v54 = vpop.f32.mrf.mxu0 }
  0xc9   :  { %v272_v47 = vadd.f32 %v1099_v54, %v79_v43  ;;  %v854_v54 = vld [vmem:[%s1152_s3 + $0x10] sm:$0xff]  }
  0xca   :  { %v266_v55 = vpop.f32.mrf.mxu0 }
  0xcb   :  { %v267_v44 = vadd.f32 %v266_v55, %v74_v40 }
  0xcc   :  { %v778_v56 = vpop.f32.mrf.mxu0 }
  0xcd   :  { %v282_v41 = vadd.f32 %v778_v56, %v89_v34  ;;  %v337_v51 = vmax.f32 %v267_v44, 0.0 }
  0xce   :  { %v276_v58 = vpop.f32.mrf.mxu0 }
  0xcf   :  { %v277_v37 = vadd.f32 %v276_v58, %v84_v30  ;;  %v340_v48 = vmax.f32 %v282_v41, 0.0  ;;  %v69_v58 = vpop.permute.xlu1 %68 }
  0xd0   :  { %v781_v60 = vpop.f32.mrf.mxu0  ;;  %v262_v56 = vadd.f32 %v1095_v52, %v69_v58  ;;  %v855_v52 = vld [vmem:[%s1152_s3 + $0x18] sm:$0xff]  }
  0xd1   :  { %v292_v35 = vadd.f32 %v781_v60, %v99_v24  ;;  %v339_v45 = vmax.f32 %v277_v37, 0.0  ;;  %v335_v60 = vmax.f32 %v257_v50, 0.0 }
  0xd2   :  { %v286_v61 = vpop.f32.mrf.mxu0 }
  0xd3   :  { %v287_v31 = vadd.f32 %v286_v61, %v94_v20  ;;  %v342_v42 = vmax.f32 %v292_v35, 0.0  ;;  %v336_v61 = vmax.f32 %v262_v56, 0.0 }
  0xd4   :  { %v784_v63 = vpop.f32.mrf.mxu0 }
  0xd5   :  { %v302_v28 = vadd.f32 %v784_v63, %v109_v12  ;;  %v341_v38 = vmax.f32 %v287_v31, 0.0  ;;  %v856_v63 = vld [vmem:[%s1152_s3 + $0x20] sm:$0xff]  }
  0xd6   :  { %v296_v1 = vpop.f32.mrf.mxu0 }
  0xd7   :  { %v297_v25 = vadd.f32 %v296_v1, %v104_v8  ;;  %v344_v36 = vmax.f32 %v302_v28, 0.0  ;;  %v370_v46 = vpack.c.bf16 %v342_v42, %v341_v38  ;;  %v858_v1 = vld [vmem:[%s1152_s3 + $0x30] sm:$0xff]  }
  0xd8   :  { %v787_v2 = vpop.f32.mrf.mxu0 }
  0xd9   :  { %v312_v21 = vadd.f32 %v787_v2, %v119_v5  ;;  %v343_v32 = vmax.f32 %v297_v25, 0.0  ;;  %v859_v2 = vld [vmem:[%s1152_s3 + $0x38] sm:$0xff]  }
  0xda   :  { %v306_v4 = vpop.f32.mrf.mxu0 }
  0xdb   :  { %v307_v16 = vadd.f32 %v306_v4, %v114_v3  ;;  %v346_v29 = vmax.f32 %v312_v21, 0.0  ;;  %v371_v39 = vpack.c.bf16 %v344_v36, %v343_v32  ;;  %v883_v3 = vmov 0.0  }
  0xdc   :  { %v790_v6 = vpop.f32.mrf.mxu0  ;;  %826 = vmatprep.subr.bf16.mxu0 %v883_v3  ;;  %842 = vmatprep.mubr.msk.bf16.mxu0 %vm884_vm1, %v883_v3 }
  0xdd   :  { %v322_v14 = vadd.f32 %v790_v6, %v129_v0  ;;  %v345_v26 = vmax.f32 %v307_v16, 0.0  ;;  %v857_v0 = vld [vmem:[%s1152_s3 + $0x28] sm:$0xff]  }
  0xde   :  { %v316_v7 = vpop.f32.mrf.mxu0 }
  0xdf   :  { %v317_v10 = vadd.f32 %v316_v7, %v124_v59  ;;  %v348_v22 = vmax.f32 %v322_v14, 0.0  ;;  %v372_v33 = vpack.c.bf16 %v346_v29, %v345_v26  ;;  %v338_v59 = vmax.f32 %v272_v47, 0.0 }
  0xe0   :  { %v793_v9 = vpop.f32.mrf.mxu0 }
  0xe1   :  { %v332_v11 = vadd.f32 %v793_v9, %v139_v62  ;;  %v347_v17 = vmax.f32 %v317_v10, 0.0  ;;  %v368_v55 = vpack.c.bf16 %v338_v59, %v337_v51  ;;  %v367_v62 = vpack.c.bf16 %v336_v61, %v335_v60  ;;  %v469_v9 = vpop.permute.xlu1 %468 }
  0xe2   :  { %v326_v13 = vpop.f32.mrf.mxu0 }
  0xe3   :  { %v327_v15 = vadd.f32 %v326_v13, %v134_v57  ;;  %v350_v18 = vmax.f32 %v332_v11, 0.0  ;;  %v373_v27 = vpack.c.bf16 %v348_v22, %v347_v17  ;;  %v369_v57 = vpack.c.bf16 %v340_v48, %v339_v45  ;;  %v464_v11 = vpop.permute.xlu0 %463 }
  0xe5   :  { %v349_v19 = vmax.f32 %v327_v15, 0.0  ;;  %v459_v14 = vpop.permute.xlu1 %458 }
  0xe7   :  { %v374_v23 = vpack.c.bf16 %v350_v18, %v349_v19  ;;  %v454_v16 = vpop.permute.xlu0 %453 }
  0xe9   :  { %794 = vmatprep.subr.bf16.mxu1 %v374_v23  ;;  %v449_v19 = vpop.permute.xlu1 %448 }
  0xea   :  { %795 = vmatpush3.bf16.msra.mxu1 %v374_v23 }
  0xeb   :  { %796 = vmatprep.subr.bf16.mxu1 %v373_v27  ;;  %v444_v21 = vpop.permute.xlu0 %443 }
  0xed   :  { %v439_v25 = vpop.permute.xlu1 %438 }
  0xee   :  { %797 = vmatpush3.bf16.msra.mxu1 %v373_v27 }
  0xef   :  { %798 = vmatprep.subr.bf16.mxu1 %v372_v33  ;;  %v434_v28 = vpop.permute.xlu0 %433 }
  0xf1   :  { %v429_v37 = vpop.permute.xlu1 %428 }
  0xf2   :  { %799 = vmatpush3.bf16.msra.mxu1 %v372_v33 }
  0xf3   :  { %800 = vmatprep.subr.bf16.mxu1 %v371_v39  ;;  %v424_v40 = vpop.permute.xlu0 %423 }
  0xf6   :  { %801 = vmatpush3.bf16.msra.mxu1 %v371_v39 }
  0xf7   :  { %802 = vmatprep.subr.bf16.mxu1 %v370_v46  ;;  %v414_v50 = vpop.permute.xlu0 %413 }
  0xfa   :  { %803 = vmatpush3.bf16.msra.mxu1 %v370_v46  ;;  %v419_v46 = vpop.permute.xlu1 %418 }
  0xfb   :  { %804 = vmatprep.subr.bf16.mxu1 %v369_v57 }
  0xfe   :  { %805 = vmatpush3.bf16.msra.mxu1 %v369_v57  ;;  %v409_v60 = vpop.permute.xlu1 %408 }
  0xff   :  { %806 = vmatprep.subr.bf16.mxu1 %v368_v55 }
 0x102   :  { %807 = vmatpush3.bf16.msra.mxu1 %v368_v55 }
 0x103   :  { %808 = vmatprep.subr.bf16.mxu1 %v367_v62 }
 0x106   :  { %809 = vmatpush3.bf16.msra.mxu1 %v367_v62  ;;  %v404_v62 = vpop.permute.xlu0 %403 }
 0x109   :  { %811 = vmatmul.mubr.bf16.vlgmr.msra.gmra.mxu1 %v853_v53 }
 0x10a   :  { %814 = vmatprep.mubr.bf16.mxu1 %v854_v54 }
 0x111   :  { %815 = vmatmul.mubr.bf16.gmra.mxu1 %v855_v52 }
 0x112   :  { %818 = vmatprep.mubr.bf16.mxu1 %v856_v63 }
 0x119   :  { %819 = vmatmul.mubr.bf16.gmra.mxu1 %v857_v0 }
 0x11a   :  { %822 = vmatprep.mubr.bf16.mxu1 %v858_v1  ;;  %v399_v1 = vpop.permute.xlu1 %398 }
 0x121   :  { %823 = vmatmul.mubr.bf16.gmra.mxu1 %v859_v2 }
 0x1c9   :  { %v1127_v4 = vpop.f32.mrf.mxu1 }
 0x1ca   :  { %v562_v63 = vadd.f32 %v1127_v4, %v404_v62 }
 0x1cb   :  { %v1129_v5 = vpop.f32.mrf.mxu1 }
 0x1cd   :  { %v813_v6 = vpop.f32.mrf.mxu1 }
 0x1ce   :  { %v565_v53 = vadd.f32 %v813_v6, %v409_v60 }
 0x1cf   :  { %v1131_v7 = vpop.f32.mrf.mxu1 }
 0x1d0   :  { %v619_v2 = vmax.f32 %v565_v53, 0.0 }
 0x1d1   :  { %v816_v8 = vpop.f32.mrf.mxu1 }
 0x1d2   :  { %v578_v51 = vadd.f32 %v816_v8, %v424_v40  ;;  %v557_v8 = vadd.f32 %v1131_v7, %v399_v1  ;;  %v632_v7 = vld [vmem:[%s1154_s5] sm:$0xf] }
 0x1d3   :  { %v569_v10 = vpop.f32.mrf.mxu1 }
 0x1d4   :  { %v622_v55 = vmax.f32 %v578_v51, 0.0  ;;  %v570_v61 = vadd.f32 %v569_v10, %v414_v50  ;;  %v618_v10 = vmax.f32 %v562_v63, 0.0 }
 0x1d5   :  { %v817_v12 = vpop.f32.mrf.mxu1 }
 0x1d6   :  { %v581_v47 = vadd.f32 %v817_v12, %v429_v37  ;;  %v620_v0 = vmax.f32 %v570_v61, 0.0  ;;  %v634_v6 = vpack.c.bf16 %v619_v2, %v618_v10 }
 0x1d7   :  { %v572_v13 = vpop.f32.mrf.mxu1 }
 0x1d8   :  { %v623_v58 = vmax.f32 %v581_v47, 0.0  ;;  %v573_v56 = vadd.f32 %v572_v13, %v419_v46  ;;  %v617_v13 = vmax.f32 %v557_v8, 0.0 }
 0x1d9   :  { %v820_v15 = vpop.f32.mrf.mxu1 }
 0x1da   :  { %v594_v38 = vadd.f32 %v820_v15, %v444_v21  ;;  %v636_v54 = vpack.c.bf16 %v623_v58, %v622_v55  ;;  %v621_v52 = vmax.f32 %v573_v56, 0.0 }
 0x1db   :  { %v585_v17 = vpop.f32.mrf.mxu1 }
 0x1dc   :  { %v626_v44 = vmax.f32 %v594_v38, 0.0  ;;  %v586_v45 = vadd.f32 %v585_v17, %v434_v28 }
 0x1dd   :  { %v821_v18 = vpop.f32.mrf.mxu1 }
 0x1de   :  { %v597_v34 = vadd.f32 %v821_v18, %v449_v19  ;;  %v624_v57 = vmax.f32 %v586_v45, 0.0 }
 0x1df   :  { %v588_v20 = vpop.f32.mrf.mxu1 }
 0x1e0   :  { %v627_v41 = vmax.f32 %v597_v34, 0.0  ;;  %v589_v42 = vadd.f32 %v588_v20, %v439_v25 }
 0x1e1   :  { %v824_v22 = vpop.f32.mrf.mxu1 }
 0x1e2   :  { %v610_v24 = vadd.f32 %v824_v22, %v464_v11  ;;  %v638_v48 = vpack.c.bf16 %v627_v41, %v626_v44  ;;  %v625_v49 = vmax.f32 %v589_v42, 0.0  ;;  %v394_v11 = vpop.permute.xlu0 %393 }
 0x1e3   :  { %v601_v23 = vpop.f32.mrf.mxu1  ;;  %v554_v12 = vadd.f32 %v1129_v5, %v394_v11 }
 0x1e4   :  { %v630_v30 = vmax.f32 %v610_v24, 0.0  ;;  %v602_v31 = vadd.f32 %v601_v23, %v454_v16  ;;  %v637_v59 = vpack.c.bf16 %v625_v49, %v624_v57 }
 0x1e5   :  { %v825_v26 = vpop.f32.mrf.mxu1 }
 0x1e6   :  { %v613_v27 = vadd.f32 %v825_v26, %v469_v9  ;;  %v628_v39 = vmax.f32 %v602_v31, 0.0  ;;  %v635_v9 = vpack.c.bf16 %v621_v52, %v620_v0  ;;  %v645_v15 = vpop.permute.xlu0 %644 }
 0x1e7   :  { %v604_v29 = vpop.f32.mrf.mxu1 }
 0x1e8   :  { %v631_v32 = vmax.f32 %v613_v27, 0.0  ;;  %v605_v33 = vadd.f32 %v604_v29, %v459_v14  ;;  %v616_v14 = vmax.f32 %v554_v12, 0.0 }
 0x1ea   :  { %v640_v35 = vpack.c.bf16 %v631_v32, %v630_v30  ;;  %v629_v36 = vmax.f32 %v605_v33, 0.0  ;;  %v633_v4 = vpack.c.bf16 %v617_v13, %v616_v14 }
 0x1ec   :  { %827 = vmatpush3.bf16.msra.mxu0 %v640_v35  ;;  %v639_v43 = vpack.c.bf16 %v629_v36, %v628_v39 }
 0x1ed   :  { %828 = vmatprep.subr.bf16.mxu0 %v883_v3 }
 0x1f0   :  { %829 = vmatpush3.bf16.msra.mxu0 %v639_v43 }
 0x1f1   :  { %830 = vmatprep.subr.bf16.mxu0 %v883_v3 }
 0x1f4   :  { %831 = vmatpush3.bf16.msra.mxu0 %v638_v48 }
 0x1f5   :  { %832 = vmatprep.subr.bf16.mxu0 %v883_v3 }
 0x1f8   :  { %833 = vmatpush3.bf16.msra.mxu0 %v637_v59 }
 0x1f9   :  { %834 = vmatprep.subr.bf16.mxu0 %v883_v3 }
 0x1fc   :  { %835 = vmatpush3.bf16.msra.mxu0 %v636_v54 }
 0x1fd   :  { %836 = vmatprep.subr.bf16.mxu0 %v883_v3 }
 0x200   :  { %837 = vmatpush3.bf16.msra.mxu0 %v635_v9 }
 0x201   :  { %838 = vmatprep.subr.bf16.mxu0 %v883_v3 }
 0x204   :  { %839 = vmatpush3.bf16.msra.mxu0 %v634_v6 }
 0x205   :  { %840 = vmatprep.subr.bf16.mxu0 %v883_v3 }
 0x208   :  { %841 = vmatpush3.bf16.msra.mxu0 %v633_v4 }
 0x20b   :  { %843 = vmatmul.mubr.bf16.vlgmr.msra.gmra.mxu0 %v632_v7 }
 0x2cb   :  { %v681_v5 = vpop.f32.mrf.mxu0 }
 0x2cc   :  { %v682_v16 = vadd.f32 %v681_v5, %v645_v15 }
 0x2cd   :  { %v844_v17 = vpop.f32.mrf.mxu0 }
 0x2ce   :  { %687 = vst [vmem:[#allocation2] sm:$0xff] %v682_v16 }
 0x2cf   :  { %v684_v18 = vpop.f32.mrf.mxu0 }
 0x2d0   :  { %871 = shalt.err (!%p868_p4)
}
 0x2d1   :  { %697 = dma.vmem_to_hbm [thread:$0]  %s695_s16, 128, %s1156_s7, [#allocation3]   ;;  %v845_v3 = vpop.f32.mrf.mxu0 }
 0x2d2   :  { %880 = dma.done.wait [#allocation3], 128  }
 0x2d3   :  { %881 = vsyncadd [#allocation3], 4294967168 }
 0x2d4   :  { %701 = vsyncpa [#allocation3], 1 }

</bundles_post_ra>
